<compile_context>
chip_gen: v6e
topology: v6e:2x2x1
jax: 0.10.0
libtpu: 0.0.40
codegen_flags: <defaults>
</compile_context>

<pallas_src>
import functools

import jax
import jax.numpy as jnp
from jax.experimental import pallas as pl
from jax.experimental.pallas import tpu as pltpu


def _ea_kernel(x_ref, wa_ref, wb_ref, o_ref, *, mxu_dtype):
    x = x_ref[0]                                   # (C, N) original input (residual)
    C = x.shape[0]

    # ---- attn_logits = W_a @ x  -> (k, N) -----------------------------------
    if C <= 8:
        # Contraction depth C is tiny: C broadcast-FMA passes on the VPU instead
        # of a nearly empty MXU contraction (review: tiny-C path).
        wa = wa_ref[...]                           # (k, C)
        attn = wa[:, 0:1] * x[0:1, :]
        for c in range(1, C):
            attn = attn + wa[:, c:c + 1] * x[c:c + 1, :]
    else:
        attn = jnp.dot(wa_ref[...].astype(mxu_dtype), x.astype(mxu_dtype),
                       preferred_element_type=jnp.float32)

    # ---- softmax over N (lane axis), then normalize over k (sublane axis) ---
    # Divisions -> EUP reciprocals + broadcast multiplies.
    m = jnp.max(attn, axis=-1, keepdims=True)                      # (k, 1)
    e = jnp.exp(attn - m)
    inv_row = pl.reciprocal(jnp.sum(e, axis=-1, keepdims=True), approx=True)
    s = e * inv_row                                                # softmax(axis=-1)
    inv_col = pl.reciprocal(1e-9 + jnp.sum(s, axis=0, keepdims=True),
                            approx=True)                           # (1, N)
    attn = s * inv_col

    # ---- y = W_b @ attn ; out = relu(y + x) ----------------------------------
    y = jnp.dot(wb_ref[...].astype(mxu_dtype), attn.astype(mxu_dtype),
                preferred_element_type=jnp.float32)                # (C, N)
    o_ref[0] = jnp.maximum(y + x, 0.0).astype(o_ref.dtype)


def _vmem_limit_bytes():
    """Raise the scoped-VMEM limit toward physical capacity, with 25% headroom."""
    try:
        cap = pltpu.get_tpu_info().vmem_capacity_bytes
        return int(cap * 3 // 4)
    except Exception:
        return None  # fall back to the compiler default


def external_attention(x, w_conv1, w_lin0, w_lin1, w_conv2,
                       *, mxu_dtype=jnp.float32):
    """x: (B, C, N) float32. Conv weights are 2-D (out_ch, in_ch) (kernel_size=1)."""
    B, C, N = x.shape
    k = w_lin0.shape[0]

    # Pre-fuse the two linear pairs (no nonlinearity in between):
    #   linear_0(conv1(x)) = (w_lin0 @ w_conv1) @ x
    #   conv2(linear_1(a)) = (w_conv2 @ w_lin1) @ a
    w_a = (w_lin0 @ w_conv1).astype(jnp.float32)   # (k, C)
    w_b = (w_conv2 @ w_lin1).astype(jnp.float32)   # (C, k)

    kernel = functools.partial(_ea_kernel, mxu_dtype=mxu_dtype)
    const2d = lambda b: (0, 0)

    return pl.pallas_call(
        kernel,
        out_shape=jax.ShapeDtypeStruct((B, C, N), x.dtype),
        grid_spec=pltpu.PrefetchScalarGridSpec(
            num_scalar_prefetch=0,
            grid=(B,),
            in_specs=[
                pl.BlockSpec((1, C, N), lambda b: (b, 0, 0)),   # x (per-batch slab)
                # Fused weights: constant index_map, only k*C floats each, so the
                # default double-buffering is cheap; use pipeline_mode=pl.Buffered(1)
                # here if C becomes large.
                pl.BlockSpec((k, C), const2d),                   # W_a = w_lin0 @ w_conv1
                pl.BlockSpec((C, k), const2d),                   # W_b = w_conv2 @ w_lin1
            ],
            out_specs=pl.BlockSpec((1, C, N), lambda b: (b, 0, 0)),
        ),
        compiler_params=pltpu.CompilerParams(
            dimension_semantics=("parallel",),
            vmem_limit_bytes=_vmem_limit_bytes(),
        ),
    )(x, w_a, w_b)


def reference(x, w_conv1, w_lin0, w_lin1, w_conv2):
    """Pure-JAX reference matching the PyTorch forward (unfused, exact divides)."""
    h = jnp.einsum("oc,bcn->bon", w_conv1, x)
    attn = jnp.einsum("kc,bcn->bkn", w_lin0, h)
    attn = jax.nn.softmax(attn, axis=-1)
    attn = attn / (1e-9 + jnp.sum(attn, axis=1, keepdims=True))
    h = jnp.einsum("ck,bkn->bcn", w_lin1, attn)
    h = jnp.einsum("oc,bcn->bon", w_conv2, h)
    return jax.nn.relu(h + x)


if __name__ == "__main__":
    # Small but lane-friendly demo: N (the softmax / spatial axis) is a multiple
    # of 128 so stores are lane-dense; C=4 exercises the tiny-C VPU path.
    B, C, N = 2, 4, 128
    K = 64  # fixed in the module: self.k = 64

    key = jax.random.PRNGKey(0)
    kx, k1, k2, k3, k4 = jax.random.split(key, 5)

    x = jax.random.normal(kx, (B, C, N), dtype=jnp.float32)

    # Deterministic, fan-in scaled weights (Conv1d kernels with kernel_size=1,
    # squeezed to (out_ch, in_ch)).
    w_conv1 = jax.random.normal(k1, (C, C), dtype=jnp.float32) * (1.0 / C) ** 0.5
    w_lin0 = jax.random.normal(k2, (K, C), dtype=jnp.float32) * (1.0 / C) ** 0.5
    w_lin1 = jax.random.normal(k3, (C, K), dtype=jnp.float32) * (1.0 / K) ** 0.5
    w_conv2 = jax.random.normal(k4, (C, C), dtype=jnp.float32) * (1.0 / C) ** 0.5

    out = external_attention(x, w_conv1, w_lin0, w_lin1, w_conv2)
    out = jax.block_until_ready(out)

    ref = reference(x, w_conv1, w_lin0, w_lin1, w_conv2)
    assert out.shape == (B, C, N)
    # Slightly loosened tolerance: weight pre-fusion changes associativity and the
    # softmax/k-norm use approximate (EUP) reciprocals.
    assert jnp.allclose(out, ref, atol=5e-3, rtol=5e-3), "mismatch vs reference"

    print("KERNEL_OK")
</pallas_src>

<mosaic_0001>
module attributes {stable_mosaic.version = 11 : i64} {
  func.func @_ea_kernel(%arg0: i32, %arg1: memref<1x4x128xf32, #tpu.memory_space<vmem>>, %arg2: memref<64x4xf32, #tpu.memory_space<vmem>>, %arg3: memref<4x64xf32, #tpu.memory_space<vmem>>, %arg4: memref<1x4x128xf32, #tpu.memory_space<vmem>>) attributes {dimension_semantics = [#tpu.dimension_semantics<parallel>], iteration_bounds = array<i64: 2>, scalar_prefetch = 0 : i64, scratch_operands = 0 : i64, tpu.core_type = #tpu.core_type<tc>, window_params = [{transform_indices = @transform_0, window_bounds = array<i64: 1, 4, 128>}, {pipeline_mode = #tpu.pipeline_mode<synchronous>, transform_indices = @transform_1, window_bounds = array<i64: 64, 4>}, {pipeline_mode = #tpu.pipeline_mode<synchronous>, transform_indices = @transform_2, window_bounds = array<i64: 4, 64>}, {transform_indices = @transform_3, window_bounds = array<i64: 1, 4, 128>}]} {
    %c0 = arith.constant 0 : index
    %c0_0 = arith.constant 0 : index
    %c0_1 = arith.constant 0 : index
    %0 = vector.load %arg1[%c0, %c0_0, %c0_1] : memref<1x4x128xf32, #tpu.memory_space<vmem>>, vector<1x4x128xf32>
    %1 = vector.shape_cast %0 : vector<1x4x128xf32> to vector<4x128xf32>
    %c0_2 = arith.constant 0 : index
    %c0_3 = arith.constant 0 : index
    %2 = vector.load %arg2[%c0_2, %c0_3] : memref<64x4xf32, #tpu.memory_space<vmem>>, vector<64x4xf32>
    %3 = vector.extract_strided_slice %2 {offsets = [0, 0], sizes = [64, 1], strides = [1, 1]} : vector<64x4xf32> to vector<64x1xf32>
    %4 = vector.extract_strided_slice %1 {offsets = [0, 0], sizes = [1, 128], strides = [1, 1]} : vector<4x128xf32> to vector<1x128xf32>
    %5 = vector.broadcast %3 : vector<64x1xf32> to vector<64x128xf32>
    %6 = vector.broadcast %4 : vector<1x128xf32> to vector<64x128xf32>
    %7 = arith.mulf %5, %6 : vector<64x128xf32>
    %8 = vector.extract_strided_slice %2 {offsets = [0, 1], sizes = [64, 1], strides = [1, 1]} : vector<64x4xf32> to vector<64x1xf32>
    %9 = vector.extract_strided_slice %1 {offsets = [1, 0], sizes = [1, 128], strides = [1, 1]} : vector<4x128xf32> to vector<1x128xf32>
    %10 = vector.broadcast %8 : vector<64x1xf32> to vector<64x128xf32>
    %11 = vector.broadcast %9 : vector<1x128xf32> to vector<64x128xf32>
    %12 = arith.mulf %10, %11 : vector<64x128xf32>
    %13 = arith.addf %7, %12 : vector<64x128xf32>
    %14 = vector.extract_strided_slice %2 {offsets = [0, 2], sizes = [64, 1], strides = [1, 1]} : vector<64x4xf32> to vector<64x1xf32>
    %15 = vector.extract_strided_slice %1 {offsets = [2, 0], sizes = [1, 128], strides = [1, 1]} : vector<4x128xf32> to vector<1x128xf32>
    %16 = vector.broadcast %14 : vector<64x1xf32> to vector<64x128xf32>
    %17 = vector.broadcast %15 : vector<1x128xf32> to vector<64x128xf32>
    %18 = arith.mulf %16, %17 : vector<64x128xf32>
    %19 = arith.addf %13, %18 : vector<64x128xf32>
    %20 = vector.extract_strided_slice %2 {offsets = [0, 3], sizes = [64, 1], strides = [1, 1]} : vector<64x4xf32> to vector<64x1xf32>
    %21 = vector.extract_strided_slice %1 {offsets = [3, 0], sizes = [1, 128], strides = [1, 1]} : vector<4x128xf32> to vector<1x128xf32>
    %22 = vector.broadcast %20 : vector<64x1xf32> to vector<64x128xf32>
    %23 = vector.broadcast %21 : vector<1x128xf32> to vector<64x128xf32>
    %24 = arith.mulf %22, %23 : vector<64x128xf32>
    %25 = arith.addf %19, %24 : vector<64x128xf32>
    %cst = arith.constant dense<0xFF800000> : vector<64xf32>
    %26 = vector.multi_reduction <maximumf>, %25, %cst [1] : vector<64x128xf32> to vector<64xf32>
    %27 = vector.shape_cast %26 : vector<64xf32> to vector<64x1xf32>
    %28 = vector.broadcast %27 : vector<64x1xf32> to vector<64x128xf32>
    %29 = arith.subf %25, %28 : vector<64x128xf32>
    %30 = math.exp %29 : vector<64x128xf32>
    %cst_4 = arith.constant dense<0.000000e+00> : vector<64xf32>
    %31 = vector.multi_reduction <add>, %30, %cst_4 [1] : vector<64x128xf32> to vector<64xf32>
    %32 = vector.shape_cast %31 : vector<64xf32> to vector<64x1xf32>
    %33 = tpu.reciprocal %32 {approx = true} : vector<64x1xf32> -> vector<64x1xf32>
    %34 = vector.broadcast %33 : vector<64x1xf32> to vector<64x128xf32>
    %35 = arith.mulf %30, %34 : vector<64x128xf32>
    %cst_5 = arith.constant dense<0.000000e+00> : vector<128xf32>
    %36 = vector.multi_reduction <add>, %35, %cst_5 [0] : vector<64x128xf32> to vector<128xf32>
    %37 = vector.shape_cast %36 : vector<128xf32> to vector<1x128xf32>
    %cst_6 = arith.constant 9.99999971E-10 : f32
    %38 = vector.broadcast %cst_6 : f32 to vector<1x128xf32>
    %39 = arith.addf %38, %37 : vector<1x128xf32>
    %40 = tpu.reciprocal %39 {approx = true} : vector<1x128xf32> -> vector<1x128xf32>
    %41 = vector.broadcast %40 : vector<1x128xf32> to vector<64x128xf32>
    %42 = arith.mulf %35, %41 : vector<64x128xf32>
    %c0_7 = arith.constant 0 : index
    %c0_8 = arith.constant 0 : index
    %43 = vector.load %arg3[%c0_7, %c0_8] : memref<4x64xf32, #tpu.memory_space<vmem>>, vector<4x64xf32>
    %cst_9 = arith.constant dense<0.000000e+00> : vector<4x128xf32>
    %44 = tpu.matmul %43, %42, %cst_9 {dimension_numbers = #tpu.dot_dimension_numbers<[1], [0], [0], [1], [0, 0, 1, 1], [], []>} : vector<4x64xf32>, vector<64x128xf32>, vector<4x128xf32> -> vector<4x128xf32>
    %45 = arith.addf %44, %1 : vector<4x128xf32>
    %cst_10 = arith.constant 0.000000e+00 : f32
    %46 = vector.broadcast %cst_10 : f32 to vector<4x128xf32>
    %47 = arith.maximumf %45, %46 : vector<4x128xf32>
    %c0_11 = arith.constant 0 : index
    %c0_12 = arith.constant 0 : index
    %c0_13 = arith.constant 0 : index
    %48 = vector.load %arg4[%c0_11, %c0_12, %c0_13] : memref<1x4x128xf32, #tpu.memory_space<vmem>>, vector<1x4x128xf32>
    %49 = vector.shape_cast %48 : vector<1x4x128xf32> to vector<4x128xf32>
    %50 = vector.shape_cast %47 : vector<4x128xf32> to vector<1x4x128xf32>
    tpu.vector_store %arg4[%c0_11, %c0_12, %c0_13], %50 {strides = array<i32>} : memref<1x4x128xf32, #tpu.memory_space<vmem>>, vector<1x4x128xf32>,
    return
  }
  func.func @transform_0(%arg0: i32) -> (i32, i32, i32) {
    %c0_i32 = arith.constant 0 : i32
    %c0_i32_0 = arith.constant 0 : i32
    %c0_i32_1 = arith.constant 0 : i32
    return %arg0, %c0_i32, %c0_i32_0 : i32, i32, i32
  }
  func.func @transform_1(%arg0: i32) -> (i32, i32) {
    %c0_i32 = arith.constant 0 : i32
    %c0_i32_0 = arith.constant 0 : i32
    %c0_i32_1 = arith.constant 0 : i32
    return %c0_i32, %c0_i32_0 : i32, i32
  }
  func.func @transform_2(%arg0: i32) -> (i32, i32) {
    %c0_i32 = arith.constant 0 : i32
    %c0_i32_0 = arith.constant 0 : i32
    %c0_i32_1 = arith.constant 0 : i32
    return %c0_i32, %c0_i32_0 : i32, i32
  }
  func.func @transform_3(%arg0: i32) -> (i32, i32, i32) {
    %c0_i32 = arith.constant 0 : i32
    %c0_i32_0 = arith.constant 0 : i32
    %c0_i32_1 = arith.constant 0 : i32
    return %arg0, %c0_i32, %c0_i32_0 : i32, i32, i32
  }
}

</mosaic_0001>

<bundles_post_ra>
// kernel: tpu_custom_call.1
= control target key start
LH: loop header
LB: loop body
LE: loop exit
PB: predicated region body
PF: predicated region fallthrough
CT: control target
= control target key end

     0   :  { %8 = vsyncpa [#allocation3], 0  ;;  %s1047_s0 = inlined_call_operand.vmem [shape: f32[2,4,128], index: 0, kind: input, shape index: {}]   ;;  %s1048_s1 = inlined_call_operand.vmem [shape: f32[64,4], index: 1, kind: input, shape index: {}]   ;;  %s1049_s2 = inlined_call_operand.vmem [shape: f32[4,64], index: 2, kind: input, shape index: {}]   ;;  %s1050_s3 = inlined_call_operand.hbm [shape: f32[2,4,128], index: 3, kind: output, shape index: {}]  }
   0x1   :  { %10 = vsyncpa [#allocation3 + $0x1], 0  ;;  %s858_s12 = smov 0   ;;  %s860_s13 = smov 0  }
   0x2   :  { %s862_s14 = smov 0   ;;  %s864_s15 = smov 0  }
   0x3 LB: > { %s879_s16 = sadd.s32 4294967295, %s829_s15   ;;  %s628_s17 = sadd.s32 4294967294, %s829_s15   ;;  %s829_s15 = sphi %s864_s15, %s1056_s15   ;;  %s825_s14 = sphi %s862_s14, %s1055_s14   ;;  %s821_s13 = sphi %s860_s13, %s1054_s13   ;;  %s817_s12 = sphi %s858_s12, %s1053_s12  }
   0x4   : > { %s883_s18 = sadd.s32 1, %s829_s15   ;;  %s91_s19 = sadd.s32 1, %s825_s14 }
   0x5   : > { %s88_s20 = ssub.s32 %s829_s15, %s883_s18  ;;  %p101_p0 = scmp.ne.s32.totalorder %s825_s14, %s821_s13 }
   0x6   : > { %p89_p1 = scmp.eq.s32.totalorder %s88_s20, 0  ;;  %p102_p2 = scmp.eq.s32.totalorder %s879_s16, 1 }
   0x7   : > { %p107_p3 = scmp.ne.s32.totalorder %s821_s13, %s817_s12  ;;  %p108_p4 = scmp.eq.s32.totalorder %s628_s17, 1 }
   0x8   : > { %s894_s21 = scalar_select %p89_p1, %s825_s14, %s91_s19  }
   0x9   : > { %p896_p5 = por %p102_p2, %p101_p0  ;;  %p900_p6 = por %p108_p4, %p107_p3 }
   0xa   : > { %p631_p7 = scmp.ge.s32.totalorder %s829_s15, 1  ;;  %p139_p8 = scmp.lt.s32.totalorder %s829_s15, 3 }
   0xc   : > { %p140_p9 = pnand %p631_p7, %p139_p8 }
   0xd   : > { %p162_p10 = scmp.lt.s32.totalorder (!%p140_p9), %s879_s16, 1  ;;  %s159_s29 = sand.u32 (!%p140_p9), 1, %s821_s13  }
   0xe   : > { %143 = sbr.rel (%p140_p9) target bundleno = 809 (0x329), region = 32  ;;  %s632_s30 = sshll.u32 (!%p140_p9), %s159_s29, 2 }
   0xf   : > { %s636_s4 = sshll.u32 (!%p140_p9), %s879_s16, 6  ;;  %s161_s5 = scalar_lea.vmem (!%p140_p9), [#allocation2], %s632_s30 }
  0x10   : > { %s569_s6 = sshll.u32 (!%p140_p9), %s161_s5, 4  ;;  %s567_s9 = scalar_lea.hbm (!%p140_p9), %s1050_s3, %s636_s4  ;;  %s570_s6 = int_to_ptr.vmem [resolvable:$true] %s569_s6 }
  0x11   : > { %s556_s10 = scalar_lea.sflag (!%p140_p9), [#allocation3], %s159_s29  ;;  %s769_s11 = scalar_lea.vmem (!%p140_p9), %s570_s6, 64 }
  0x12   : > { %p770_p11 = scmp.ne.s32.totalorder (!%p140_p9), %s570_s6, %s769_s11  ;;  %s837_s17 = smov (!%p140_p9), [#allocation2]  }
  0x13   : > { %v168_v0 = vld [vmem:[%s1048_s1 + $0x8] sm:$0xff]  ;;  %v167_v1 = vld [vmem:[%s1048_s1] sm:$0xff]  ;;  %v831_v2 = vmov 3   ;;  %v832_v3 = vmov 1   ;;  %v170_v4 = vld [vmem:[%s1048_s1 + $0x18] sm:$0xff]  ;;  %v833_v7 = vmov 2   ;;  %v215_v15 = vlaneseq }
  0x14   : > { %717 = vset.pattern.permute.xlu0 %v831_v2  ;;  %712 = vset.pattern.permute.xlu1 %v832_v3  ;;  %v169_v5 = vld [vmem:[%s1048_s1 + $0x10] sm:$0xff]  ;;  %v172_v6 = vld [vmem:[%s1048_s1 + $0x28] sm:$0xff]  ;;  %v834_v8 = vmov 0   ;;  %v171_v10 = vld [vmem:[%s1048_s1 + $0x20] sm:$0xff]  ;;  %s163_s19 = scalar_select %p162_p10, %s879_s16, 1  ;;  %vm836_vm0 = vmmov 0  }
  0x15   : > { %336 = vperm.xlu0 %717, %v168_v0   ;;  %228 = vperm.xlu1 %712, %v167_v1   ;;  %v173_v9 = vld [vmem:[%s1048_s1 + $0x30] sm:$0xff]  ;;  %v174_v11 = vld [vmem:[%s1048_s1 + $0x38] sm:$0xff]  ;;  %v216_v18 = vshrl.u32 %v215_v15, 7  ;;  %vm479_vm1 = vcmask 523264   ;;  %p771_p12 = pnand %p770_p11, %p896_p5  ;;  %s773_s16 = sshll.u32 %s837_s17, 4  ;;  %s774_s16 = int_to_ptr.vmem [resolvable:$false] %s773_s16 }
  0x16   : > { %s633_s20 = sshll.u32 %s163_s19, 2  ;;  %s775_s19 = scalar_lea.vmem %s774_s16, 128 }
  0x17   : > { %s165_s26 = scalar_lea.vmem %s1047_s0, %s633_s20  ;;  %v261_v20 = vsub.s32 1, %v216_v18  ;;  %v365_v21 = vsub.s32 3, %v216_v18  ;;  %v313_v22 = vsub.s32 2, %v216_v18  ;;  %v217_v24 = vsub.s32 0, %v216_v18  ;;  %p772_p13 = pneg %p771_p12 }
  0x18   : > { %v937_v25 = vld [vmem:[%s165_s26] sm:$0xf]  ;;  %p776_p0 = scmp.lt.s32.totalorder %s570_s6, %s774_s16  ;;  %p777_p1 = scmp.lt.s32.totalorder %s775_s19, %s769_s11 }
  0x19   : > { %718 = vset.pattern.permute.xlu0 %v832_v3  ;;  %232 = vperm.xlu1 %712, %v168_v0   ;;  %v940_v27 = vrot.slane %v937_v25, %v261_v20  ;;  %v943_v28 = vrot.slane %v937_v25, %v365_v21  ;;  %v946_v29 = vrot.slane %v937_v25, %v313_v22 }
  0x1a   : > { %240 = vperm.xlu0 %718, %v170_v4   ;;  %v949_v30 = vrot.slane %v937_v25, %v217_v24  ;;  %p778_p2 = por %p777_p1, %p776_p0 }
  0x1c   : > { %p779_p3 = pnand %p778_p2, %p772_p13 }
  0x1d   : > { %236 = vperm.xlu1 %712, %v169_v5  }
  0x1e   : > { %248 = vperm.xlu0 %718, %v172_v6  }
  0x21   : > { %713 = vset.pattern.permute.xlu1 %v833_v7 }
  0x22   : > { %723 = vset.pattern.permute.xlu0 %v834_v8  ;;  %284 = vperm.xlu1 %713, %v168_v0  }
  0x23   : > { %177 = vperm.xlu0 %723, %v167_v1  }
  0x26   : > { %714 = vset.pattern.permute.xlu1 %v834_v8 }
  0x27   : > { %182 = vperm.xlu0 %723, %v168_v0   ;;  %192 = vperm.xlu1 %714, %v170_v4  }
  0x2b   : > { %187 = vperm.xlu0 %723, %v169_v5   ;;  %715 = vset.pattern.permute.xlu1 %v833_v7 }
  0x2c   : > { %288 = vperm.xlu1 %715, %v169_v5  }
  0x2f   : > { %207 = vperm.xlu0 %723, %v173_v9  }
  0x30   : > { %716 = vset.pattern.permute.xlu1 %v831_v2 }
  0x31   : > { %332 = vperm.xlu1 %716, %v167_v1  }
  0x33   : > { %726 = vset.pattern.permute.xlu0 %v833_v7 }
  0x34   : > { %280 = vperm.xlu0 %726, %v167_v1  }
  0x35   : > { %719 = vset.pattern.permute.xlu1 %v834_v8 }
  0x36   : > { %197 = vperm.xlu1 %719, %v171_v10  }
  0x38   : > { %292 = vperm.xlu0 %726, %v170_v4  }
  0x3a   : > { %720 = vset.pattern.permute.xlu1 %v832_v3 }
  0x3b   : > { %244 = vperm.xlu1 %720, %v171_v10  }
  0x3c   : > { %304 = vperm.xlu0 %726, %v173_v9  }
  0x3f   : > { %721 = vset.pattern.permute.xlu1 %v831_v2 }
  0x40   : > { %340 = vperm.xlu1 %721, %v169_v5   ;;  %731 = vset.pattern.permute.xlu0 %v831_v2 }
  0x41   : > { %348 = vperm.xlu0 %731, %v171_v10  }
  0x44   : > { %722 = vset.pattern.permute.xlu1 %v834_v8 }
  0x45   : > { %202 = vperm.xlu1 %722, %v172_v6   ;;  %356 = vperm.xlu0 %731, %v173_v9  }
  0x49   : > { %724 = vset.pattern.permute.xlu1 %v833_v7 }
  0x4a   : > { %296 = vperm.xlu1 %724, %v171_v10  }
  0x4e   : > { %725 = vset.pattern.permute.xlu1 %v831_v2 }
  0x4f   : > { %344 = vperm.xlu1 %725, %v170_v4  }
  0x53   : > { %727 = vset.pattern.permute.xlu1 %v832_v3 }
  0x54   : > { %252 = vperm.xlu1 %727, %v173_v9  }
  0x58   : > { %728 = vset.pattern.permute.xlu1 %v833_v7 }
  0x59   : > { %300 = vperm.xlu1 %728, %v172_v6  }
  0x5d   : > { %729 = vset.pattern.permute.xlu1 %v834_v8 }
  0x5e   : > { %212 = vperm.xlu1 %729, %v174_v11  }
  0x62   : > { %730 = vset.pattern.permute.xlu1 %v832_v3 }
  0x63   : > { %256 = vperm.xlu1 %730, %v174_v11  }
  0x67   : > { %732 = vset.pattern.permute.xlu1 %v831_v2 }
  0x68   : > { %352 = vperm.xlu1 %732, %v172_v6  }
  0x6c   : > { %733 = vset.pattern.permute.xlu1 %v833_v7 }
  0x6d   : > { %308 = vperm.xlu1 %733, %v174_v11  }
  0x71   : > { %734 = vset.pattern.permute.xlu1 %v831_v2 }
  0x72   : > { %360 = vperm.xlu1 %734, %v174_v11  }
  0x90   : > { %v229_v12 = vpop.permute.xlu1 %228  ;;  %v337_v13 = vpop.permute.xlu0 %336 }
  0x91   : > { %v368_v35 = vmul.f32 %v943_v28, %v337_v13  ;;  %v263_v45 = vmul.f32 %v940_v27, %v229_v12 }
  0x94   : > { %v233_v14 = vpop.permute.xlu1 %232 }
  0x95   : > { %v241_v16 = vpop.permute.xlu0 %240  ;;  %v264_v33 = vmul.f32 %v940_v27, %v233_v14 }
  0x96   : > { %v266_v4 = vmul.f32 %v940_v27, %v241_v16 }
  0x98   : > { %v237_v17 = vpop.permute.xlu1 %236 }
  0x99   : > { %v932_v19 = vpop.permute.xlu0 %248  ;;  %v265_v54 = vmul.f32 %v940_v27, %v237_v17 }
  0x9d   : > { %v285_v23 = vpop.permute.xlu1 %284 }
  0x9e   : > { %v178_v26 = vpop.permute.xlu0 %177  ;;  %v316_v36 = vmul.f32 %v946_v29, %v285_v23 }
  0x9f   : > { %v219_v43 = vmul.f32 %v949_v30, %v178_v26 }
  0xa1   : > { %v271_v47 = vadd.f32 %v263_v45, %v219_v43 }
  0xa2   : > { %v183_v31 = vpop.permute.xlu0 %182  ;;  %v193_v32 = vpop.permute.xlu1 %192 }
  0xa3   : > { %v220_v34 = vmul.f32 %v949_v30, %v183_v31  ;;  %v222_v5 = vmul.f32 %v949_v30, %v193_v32 }
  0xa5   : > { %v272_v37 = vadd.f32 %v264_v33, %v220_v34  ;;  %v274_v12 = vadd.f32 %v266_v4, %v222_v5 }
  0xa6   : > { %v188_v38 = vpop.permute.xlu0 %187 }
  0xa7   : > { %v289_v39 = vpop.permute.xlu1 %288  ;;  %v324_v40 = vadd.f32 %v316_v36, %v272_v37  ;;  %v221_v52 = vmul.f32 %v949_v30, %v188_v38 }
  0xa8   : > { %v317_v57 = vmul.f32 %v946_v29, %v289_v39 }
  0xa9   : > { %v955_v41 = vadd.f32 %v368_v35, %v324_v40  ;;  %v273_v56 = vadd.f32 %v265_v54, %v221_v52  ;;  %v268_v35 = vmul.f32 %v940_v27, %v932_v19 }
  0xaa   : > { %v208_v42 = vpop.permute.xlu0 %207 }
  0xab   : > { %385 = vmax.xlane.f32.xlu0 %v955_v41  ;;  %v325_v60 = vadd.f32 %v317_v57, %v273_v56  ;;  %v225_v21 = vmul.f32 %v949_v30, %v208_v42 }
  0xac   : > { %v333_v44 = vpop.permute.xlu1 %332 }
  0xad   : > { %v367_v50 = vmul.f32 %v943_v28, %v333_v44 }
  0xaf   : > { %v281_v46 = vpop.permute.xlu0 %280 }
  0xb0   : > { %v315_v48 = vmul.f32 %v946_v29, %v281_v46 }
  0xb1   : > { %v198_v49 = vpop.permute.xlu1 %197 }
  0xb2   : > { %v323_v51 = vadd.f32 %v315_v48, %v271_v47  ;;  %v223_v3 = vmul.f32 %v949_v30, %v198_v49 }
  0xb3   : > { %v293_v58 = vpop.permute.xlu0 %292 }
  0xb4   : > { %v963_v53 = vadd.f32 %v367_v50, %v323_v51  ;;  %v318_v10 = vmul.f32 %v946_v29, %v293_v58 }
  0xb6   : > { %v245_v55 = vpop.permute.xlu1 %244  ;;  %383 = vmax.xlane.f32.xlu1 %v963_v53  ;;  %v326_v15 = vadd.f32 %v318_v10, %v274_v12 }
  0xb7   : > { %v305_v62 = vpop.permute.xlu0 %304  ;;  %v267_v1 = vmul.f32 %v940_v27, %v245_v55 }
  0xb8   : > { %v321_v22 = vmul.f32 %v946_v29, %v305_v62 }
  0xb9   : > { %v275_v7 = vadd.f32 %v267_v1, %v223_v3 }
  0xbb   : > { %v341_v59 = vpop.permute.xlu1 %340 }
  0xbc   : > { %v369_v61 = vmul.f32 %v943_v28, %v341_v59  ;;  %v349_v2 = vpop.permute.xlu0 %348 }
  0xbd   : > { %v371_v9 = vmul.f32 %v943_v28, %v349_v2 }
  0xbe   : > { %v969_v63 = vadd.f32 %v369_v61, %v325_v60 }
  0xc0   : > { %v203_v0 = vpop.permute.xlu1 %202  ;;  %387 = vmax.xlane.f32.xlu0 %v969_v63  ;;  %v357_v20 = vpop.permute.xlu0 %356 }
  0xc1   : > { %v373_v26 = vmul.f32 %v943_v28, %v357_v20  ;;  %v224_v36 = vmul.f32 %v949_v30, %v203_v0 }
  0xc3   : > { %v276_v39 = vadd.f32 %v268_v35, %v224_v36 }
  0xc5   : > { %v297_v6 = vpop.permute.xlu1 %296 }
  0xc6   : > { %v319_v8 = vmul.f32 %v946_v29, %v297_v6 }
  0xc8   : > { %v327_v11 = vadd.f32 %v319_v8, %v275_v7 }
  0xca   : > { %v345_v13 = vpop.permute.xlu1 %344  ;;  %v379_v14 = vadd.f32 %v371_v9, %v327_v11 }
  0xcb   : > { %v370_v17 = vmul.f32 %v943_v28, %v345_v13 }
  0xcc   : > { %391 = vmax.xlane.f32.xlu0 %v379_v14 }
  0xcd   : > { %v378_v18 = vadd.f32 %v370_v17, %v326_v15  ;;  %v835_v17 = vmov 0.0  }
  0xce   : > { %648 = vmatprep.subr.mxu0 %v835_v17  ;;  %664 = vmatprep.mubr.msk.f32.mxu0 %vm836_vm0, %v835_v17 }
  0xcf   : > { %v253_v16 = vpop.permute.xlu1 %252  ;;  %389 = vmax.xlane.f32.xlu1 %v378_v18 }
  0xd0   : > { %v269_v23 = vmul.f32 %v940_v27, %v253_v16 }
  0xd2   : > { %v277_v24 = vadd.f32 %v269_v23, %v225_v21 }
  0xd4   : > { %v301_v31 = vpop.permute.xlu1 %300  ;;  %v329_v32 = vadd.f32 %v321_v22, %v277_v24 }
  0xd5   : > { %v320_v38 = vmul.f32 %v946_v29, %v301_v31 }
  0xd6   : > { %v381_v33 = vadd.f32 %v373_v26, %v329_v32 }
  0xd7   : > { %v328_v42 = vadd.f32 %v320_v38, %v276_v39 }
  0xd8   : > { %395 = vmax.xlane.f32.xlu0 %v381_v33 }
  0xd9   : > { %v213_v34 = vpop.permute.xlu1 %212 }
  0xda   : > { %v226_v47 = vmul.f32 %v949_v30, %v213_v34 }
  0xde   : > { %v257_v37 = vpop.permute.xlu1 %256 }
  0xdf   : > { %v270_v45 = vmul.f32 %v940_v27, %v257_v37 }
  0xe1   : > { %v278_v19 = vadd.f32 %v270_v45, %v226_v47 }
  0xe3   : > { %v353_v40 = vpop.permute.xlu1 %352 }
  0xe4   : > { %v372_v43 = vmul.f32 %v943_v28, %v353_v40 }
  0xe6   : > { %v380_v44 = vadd.f32 %v372_v43, %v328_v42 }
  0xe8   : > { %v309_v46 = vpop.permute.xlu1 %308  ;;  %393 = vmax.xlane.f32.xlu1 %v380_v44 }
  0xe9   : > { %v322_v48 = vmul.f32 %v946_v29, %v309_v46 }
  0xeb   : > { %v330_v50 = vadd.f32 %v322_v48, %v278_v19 }
  0xed   : > { %v361_v49 = vpop.permute.xlu1 %360 }
  0xee   : > { %v374_v51 = vmul.f32 %v943_v28, %v361_v49 }
  0xf0   : > { %v382_v52 = vadd.f32 %v374_v51, %v330_v50 }
  0xf2   : > { %397 = vmax.xlane.f32.xlu1 %v382_v52 }
 0x134   : > { %v386_v54 = vpop.xlane.xlu0 %385 }
 0x135   : > { %v400_v55 = vsub.f32 %v955_v41, %v386_v54 }
 0x137   : > { %v409_v56 = vmul.f32 1.442695, %v400_v55 }
 0x139   : > { %735 = vpow2.f32 %v409_v56 }
 0x13f   : > { %v384_v57 = vpop.xlane.xlu1 %383 }
 0x140   : > { %v399_v27 = vsub.f32 %v963_v53, %v384_v57 }
 0x142   : > { %v407_v58 = vmul.f32 1.442695, %v399_v27 }
 0x144   : > { %737 = vpow2.f32 %v407_v58 }
 0x146   : > { %v995_v30 = vpop.eup %735 }
 0x147   : > { %425 = vadd.xlane.f32.xlu1 %v995_v30 }
 0x149   : > { %v388_v29 = vpop.xlane.xlu0 %387 }
 0x14a   : > { %v401_v59 = vsub.f32 %v969_v63, %v388_v29 }
 0x14c   : > { %v411_v28 = vmul.f32 1.442695, %v401_v59 }
 0x14e   : > { %739 = vpow2.f32 %v411_v28 }
 0x151   : > { %v738_v60 = vpop.eup %737 }
 0x152   : > { %423 = vadd.xlane.f32.xlu0 %v738_v60 }
 0x155   : > { %v392_v61 = vpop.xlane.xlu0 %391 }
 0x156   : > { %v403_v41 = vsub.f32 %v379_v14, %v392_v61 }
 0x158   : > { %v415_v62 = vmul.f32 1.442695, %v403_v41  ;;  %v390_v0 = vpop.xlane.xlu1 %389 }
 0x159   : > { %v402_v1 = vsub.f32 %v378_v18, %v390_v0 }
 0x15a   : > { %741 = vpow2.f32 %v415_v62 }
 0x15b   : > { %v740_v53 = vpop.eup %739  ;;  %v413_v2 = vmul.f32 1.442695, %v402_v1 }
 0x15c   : > { %427 = vadd.xlane.f32.xlu0 %v740_v53 }
 0x15d   : > { %743 = vpow2.f32 %v413_v2  ;;  %v478_v2 = vld [vmem:[%s1049_s2] sm:$0xf] }
 0x161   : > { %v396_v3 = vpop.xlane.xlu0 %395 }
 0x162   : > { %v405_v4 = vsub.f32 %v381_v33, %v396_v3 }
 0x164   : > { %v419_v5 = vmul.f32 1.442695, %v405_v4 }
 0x166   : > { %745 = vpow2.f32 %v419_v5 }
 0x167   : > { %v742_v6 = vpop.eup %741 }
 0x168   : > { %431 = vadd.xlane.f32.xlu0 %v742_v6 }
 0x16a   : > { %v744_v63 = vpop.eup %743 }
 0x16b   : > { %429 = vadd.xlane.f32.xlu1 %v744_v63 }
 0x171   : > { %v394_v7 = vpop.xlane.xlu1 %393 }
 0x172   : > { %v404_v8 = vsub.f32 %v380_v44, %v394_v7 }
 0x173   : > { %v746_v9 = vpop.eup %745 }
 0x174   : > { %v417_v10 = vmul.f32 1.442695, %v404_v8  ;;  %435 = vadd.xlane.f32.xlu0 %v746_v9 }
 0x176   : > { %747 = vpow2.f32 %v417_v10 }
 0x17b   : > { %v398_v11 = vpop.xlane.xlu1 %397 }
 0x17c   : > { %v406_v12 = vsub.f32 %v382_v52, %v398_v11 }
 0x17e   : > { %v421_v13 = vmul.f32 1.442695, %v406_v12 }
 0x180   : > { %749 = vpow2.f32 %v421_v13 }
 0x183   : > { %v748_v14 = vpop.eup %747 }
 0x184   : > { %433 = vadd.xlane.f32.xlu1 %v748_v14 }
 0x18d   : > { %v750_v15 = vpop.eup %749 }
 0x18e   : > { %437 = vadd.xlane.f32.xlu1 %v750_v15 }
 0x1d0   : > { %v426_v16 = vpop.xlane.xlu1 %425 }
 0x1db   : > { %v424_v18 = vpop.xlane.xlu0 %423 }
 0x1dc   : > { %751 = vrcp.f32 %v424_v18 }
 0x1dd   : > { %753 = vrcp.f32 %v426_v16 }
 0x1e5   : > { %v428_v20 = vpop.xlane.xlu0 %427 }
 0x1e6   : > { %755 = vrcp.f32 %v428_v20 }
 0x1e9   : > { %v752_v24 = vpop.eup %751 }
 0x1ea   : > { %v754_v31 = vpop.eup %753  ;;  %v447_v33 = vmul.f32 %v752_v24, %v738_v60 }
 0x1eb   : > { %v448_v35 = vmul.f32 %v754_v31, %v995_v30 }
 0x1ed   : > { %v455_v38 = vadd.f32 %v448_v35, %v447_v33 }
 0x1f1   : > { %v432_v22 = vpop.xlane.xlu0 %431 }
 0x1f3   : > { %v756_v32 = vpop.eup %755 }
 0x1f4   : > { %v430_v21 = vpop.xlane.xlu1 %429  ;;  %v449_v36 = vmul.f32 %v756_v32, %v740_v53 }
 0x1f5   : > { %757 = vrcp.f32 %v430_v21 }
 0x1f6   : > { %759 = vrcp.f32 %v432_v22  ;;  %v456_v42 = vadd.f32 %v455_v38, %v449_v36 }
 0x1fd   : > { %v436_v26 = vpop.xlane.xlu0 %435 }
 0x202   : > { %v758_v34 = vpop.eup %757 }
 0x203   : > { %v450_v39 = vmul.f32 %v758_v34, %v744_v63  ;;  %v760_v40 = vpop.eup %759 }
 0x204   : > { %v451_v45 = vmul.f32 %v760_v40, %v742_v6 }
 0x205   : > { %v457_v44 = vadd.f32 %v456_v42, %v450_v39 }
 0x207   : > { %v458_v47 = vadd.f32 %v457_v44, %v451_v45 }
 0x20d   : > { %v434_v23 = vpop.xlane.xlu1 %433 }
 0x20e   : > { %761 = vrcp.f32 %v434_v23 }
 0x20f   : > { %763 = vrcp.f32 %v436_v26 }
 0x217   : > { %v438_v37 = vpop.xlane.xlu1 %437 }
 0x218   : > { %765 = vrcp.f32 %v438_v37 }
 0x21b   : > { %v762_v43 = vpop.eup %761 }
 0x21c   : > { %v452_v46 = vmul.f32 %v762_v43, %v748_v14  ;;  %v764_v48 = vpop.eup %763 }
 0x21d   : > { %v453_v49 = vmul.f32 %v764_v48, %v746_v9 }
 0x21e   : > { %v459_v19 = vadd.f32 %v458_v47, %v452_v46 }
 0x220   : > { %v460_v52 = vadd.f32 %v459_v19, %v453_v49 }
 0x225   : > { %v766_v50 = vpop.eup %765 }
 0x226   : > { %v454_v51 = vmul.f32 %v766_v50, %v750_v15 }
 0x228   : > { %v461_v54 = vadd.f32 %v460_v52, %v454_v51 }
 0x22a   : > { %v462_v55 = vrot.slane %v461_v54, 4 }
 0x22c   : > { %v463_v56 = vadd.f32 %v462_v55, %v461_v54 }
 0x22e   : > { %v464_v57 = vrot.slane %v463_v56, 2 }
 0x230   : > { %v465_v27 = vadd.f32 %v464_v57, %v463_v56 }
 0x232   : > { %v466_v58 = vrot.slane %v465_v27, 1 }
 0x234   : > { %v467_v30 = vadd.f32 %v466_v58, %v465_v27 }
 0x236   : > { %v468_v29 = vadd.f32 1e-09, %v467_v30 }
 0x238   : > { %767 = vrcp.f32 %v468_v29 }
 0x245   : > { %v768_v59 = vpop.eup %767 }
 0x246   : > { %v477_v28 = vmul.f32 %v768_v59, %v454_v51  ;;  %v476_v60 = vmul.f32 %v768_v59, %v453_v49  ;;  %v475_v61 = vmul.f32 %v768_v59, %v452_v46  ;;  %v474_v41 = vmul.f32 %v768_v59, %v451_v45 }
 0x247   : > { %v473_v62 = vmul.f32 %v768_v59, %v450_v39  ;;  %v472_v0 = vmul.f32 %v768_v59, %v449_v36  ;;  %v471_v1 = vmul.f32 %v768_v59, %v448_v35  ;;  %v470_v53 = vmul.f32 %v768_v59, %v447_v33 }
 0x248   : > { %649 = vmatpush3.msra.mxu0 %v477_v28 }
 0x249   : > { %650 = vmatprep.subr.mxu0 %v835_v17 }
 0x24a   : > { %651 = vmatpush3.msra.mxu0 %v476_v60 }
 0x24b   : > { %652 = vmatprep.subr.mxu0 %v835_v17 }
 0x24c   : > { %653 = vmatpush3.msra.mxu0 %v475_v61 }
 0x24d   : > { %654 = vmatprep.subr.mxu0 %v835_v17 }
 0x24e   : > { %655 = vmatpush3.msra.mxu0 %v474_v41 }
 0x24f   : > { %656 = vmatprep.subr.mxu0 %v835_v17 }
 0x250   : > { %657 = vmatpush3.msra.mxu0 %v473_v62 }
 0x251   : > { %658 = vmatprep.subr.mxu0 %v835_v17 }
 0x252   : > { %659 = vmatpush3.msra.mxu0 %v472_v0 }
 0x253   : > { %660 = vmatprep.subr.mxu0 %v835_v17 }
 0x254   : > { %661 = vmatpush3.msra.mxu0 %v471_v1 }
 0x255   : > { %662 = vmatprep.subr.mxu0 %v835_v17 }
 0x256   : > { %663 = vmatpush3.msra.mxu0 %v470_v53 }
 0x257   : > { %665 = vmatmul.mubr.msk.f32.vlgmr.msra.gmra.mxu0 %vm479_vm1, %v478_v2 }
 0x317   : > { %v549_v3 = vpop.f32.mrf.mxu0 }
 0x318   : > { %v550_v4 = vadd.f32 %v549_v3, %v937_v25 }
 0x319   : > { %v666_v5 = vpop.f32.mrf.mxu0 }
 0x31a   : > { %v553_v6 = vmax.f32 %v550_v4, 0.0 }
 0x31c   : > { %554 = vst [vmem:[%s161_s5] sm:$0xf] %v553_v6 }
 0x31d   : > { %782 = shalt.err (!%p779_p3)
}
 0x31e   : > { %s783_s20 = scalar_lea.hbm %s567_s9, 64  ;;  %s787_s26 = scalar_lea.hbm %s1050_s3, 128 }
 0x31f   : > { %p784_p4 = scmp.ne.s32.totalorder %s567_s9, %s783_s20  ;;  %p788_p9 = scmp.lt.s32.totalorder %s567_s9, %s1050_s3 }
 0x320   : > { %p789_p10 = scmp.lt.s32.totalorder %s787_s26, %s783_s20 }
 0x321   : > { %p785_p7 = pnand %p784_p4, %p896_p5 }
 0x322   : > { %p790_p11 = por %p789_p10, %p788_p9 }
 0x323   : > { %p786_p8 = pneg %p785_p7 }
 0x325   : > { %p791_p12 = pnand %p790_p11, %p786_p8 }
 0x327   : > { %794 = shalt.err (!%p791_p12)
}
 0x328   : > { %667 = dma.vmem_to_hbm [thread:$0]  (%p896_p5), %s570_s6, 64, %s567_s9, %s556_s10  }
 0x329 PF: > { %p673_p13 = scmp.ge.s32.totalorder %s829_s15, 2  ;;  %s581_s29 = sand.u32 1, %s817_s12  }
 0x32a   : > { %s582_s30 = scalar_lea.sflag [#allocation3], %s581_s29 }
 0x32b   : > { %p670_p0 = pnand %p673_p13, %p900_p6 }
 0x32d   : > { %p671_p1 = pneg %p670_p0 }
 0x32f   : > { %812 = dma.done.wait (%p671_p1), %s582_s30, 64  }
 0x330   : > { %814 = vsyncadd (%p671_p1), %s582_s30, 4294967232  ;;  %p13_p2 = scmp.ge.s32.totalorder %s883_s18, 4   ;;  %s1053_s12 = smov %s821_s13 }
 0x331   : > { %s1054_s13 = smov %s825_s14  ;;  %s1055_s14 = smov %s894_s21 }
 0x332   : > { %s1056_s15 = smov %s883_s18  ;;  %15 = sbr.rel (!%p13_p2) target bundleno = 3 (0x3), region = 67 }
 0x337   :  { %587 = vsyncpa [#allocation3], 1 }
 0x338   :  { %589 = vsyncpa [#allocation3 + $0x1], 1 }

</bundles_post_ra>
